<compile_context>
chip_gen: v7x
topology: tpu7x:2x2x1
jax: 0.10.0
libtpu: 0.0.40
codegen_flags: <defaults>
</compile_context>

<pallas_src>
import math
import functools

import jax
import jax.numpy as jnp
from jax import lax
from jax.experimental import pallas as pl
from jax.experimental.pallas import tpu as pltpu


def _attn_kernel(hs_ref, kv_ref, wq_ref, bq_ref, out_ref, ctx_ref,
                 *, head_dim, group, kv_tile, kv_len):
    # hs_ref : (1, TQ, D)     query-side rows of hidden_states
    # kv_ref : (1, S,  G*Dh)  K == V column slab of hidden_states (G heads)
    # wq_ref : (D, G*Dh)      query weight columns, pre-scaled by 1/sqrt(Dh)
    # bq_ref : (1, G*Dh)      query bias columns, pre-scaled by 1/sqrt(Dh)
    # out_ref: (1, TQ, G*Dh)  context columns, written lane-dense into (B,S,D)
    # ctx_ref: (TQ, G*Dh) f32 VMEM scratch (per-head accumulation target)
    in_dtype = kv_ref.dtype
    x = hs_ref[0]                       # (TQ, D)
    w = wq_ref[...]                     # (D, G*Dh)
    b = bq_ref[...]                     # (1, G*Dh)

    # Query projection for all G heads at once (MXU, f32 accumulation), then a
    # single cast back to the input dtype so Q@K^T uses the native MXU path.
    q = jnp.dot(x, w, preferred_element_type=jnp.float32) + b       # (TQ, G*Dh)
    q = q.astype(in_dtype)
    q_heads = [q[:, j * head_dim:(j + 1) * head_dim] for j in range(group)]

    num_kv = kv_len // kv_tile

    if num_kv == 1:
        # Single-pass softmax: the whole (TQ, S) score tile fits comfortably.
        kv = kv_ref[0]                                               # (S, G*Dh)
        for j in range(group):
            lo = j * head_dim
            k_j = kv[:, lo:lo + head_dim]                            # (S, Dh)
            s_j = lax.dot_general(
                q_heads[j], k_j,
                dimension_numbers=(((1,), (1,)), ((), ())),
                preferred_element_type=jnp.float32)                  # (TQ, S)
            s_j = s_j - jnp.max(s_j, axis=-1, keepdims=True)
            p_j = jnp.exp(s_j)
            inv = pl.reciprocal(jnp.sum(p_j, axis=-1, keepdims=True),
                                approx=True)
            ctx_j = jnp.dot(p_j.astype(in_dtype), k_j,
                            preferred_element_type=jnp.float32) * inv
            ctx_ref[:, lo:lo + head_dim] = ctx_j
    else:
        # Flash-style online softmax over KV tiles of width kv_tile.
        tq = q.shape[0]
        init = tuple(
            (jnp.full((tq, 1), -jnp.inf, dtype=jnp.float32),   # running max
             jnp.zeros((tq, 1), dtype=jnp.float32),            # running sum
             jnp.zeros((tq, head_dim), dtype=jnp.float32))     # accumulator
            for _ in range(group))

        def body(t, state):
            start = pl.multiple_of(t * kv_tile, kv_tile)
            kv_t = kv_ref[0, pl.ds(start, kv_tile), :]               # (TK, G*Dh)
            new_state = []
            for j in range(group):
                m_j, l_j, acc_j = state[j]
                lo = j * head_dim
                k_j = kv_t[:, lo:lo + head_dim]                      # (TK, Dh)
                s_j = lax.dot_general(
                    q_heads[j], k_j,
                    dimension_numbers=(((1,), (1,)), ((), ())),
                    preferred_element_type=jnp.float32)              # (TQ, TK)
                m_new = jnp.maximum(m_j, jnp.max(s_j, axis=-1, keepdims=True))
                alpha = jnp.exp(m_j - m_new)
                p_j = jnp.exp(s_j - m_new)
                l_new = alpha * l_j + jnp.sum(p_j, axis=-1, keepdims=True)
                acc_new = alpha * acc_j + jnp.dot(
                    p_j.astype(in_dtype), k_j,
                    preferred_element_type=jnp.float32)
                new_state.append((m_new, l_new, acc_new))
            return tuple(new_state)

        state = lax.fori_loop(0, num_kv, body, init)
        for j in range(group):
            _, l_j, acc_j = state[j]
            lo = j * head_dim
            ctx_ref[:, lo:lo + head_dim] = acc_j * pl.reciprocal(l_j,
                                                                 approx=True)

    out_ref[0] = ctx_ref[...].astype(out_ref.dtype)


def _pick_group(num_heads, head_dim, hidden_dim):
    """Largest divisor G of H whose column slab G*Dh is lane-legal
    (multiple of 128 or the whole hidden dim) and not excessively wide."""
    valid = [g for g in range(1, num_heads + 1)
             if num_heads % g == 0
             and (g * head_dim % 128 == 0 or g * head_dim == hidden_dim)]
    capped = [g for g in valid if g * head_dim <= 512]
    return max(capped) if capped else min(valid)


def _pick_q_tile(seq_len, max_q_tile):
    """Query tile: prefer a sublane-aligned divisor of S (no OOB tail reads)."""
    if seq_len <= max_q_tile:
        return seq_len
    for tq in range(max_q_tile, 7, -1):
        if seq_len % tq == 0 and tq % 8 == 0:
            return tq
    return max_q_tile   # fallback: tail rows read padding, outputs discarded


def _pick_kv_tile(seq_len, max_kv_tile):
    """KV chunk for the online softmax: a multiple of 128 that divides S."""
    if seq_len <= max_kv_tile:
        return seq_len
    for tk in range((max_kv_tile // 128) * 128, 0, -128):
        if seq_len % tk == 0:
            return tk
    return seq_len      # fallback: single pass over the full sequence


def attention_forward(hidden_states, wq, bq, num_heads, *,
                      max_q_tile=512, max_kv_tile=1024):
    """hidden_states: (B, S, D); wq: (D, D) torch-style (out, in); bq: (D,)."""
    B, S, D = hidden_states.shape
    H = num_heads
    Dh = D // H
    G = _pick_group(H, Dh, D)
    GDh = G * Dh
    scale = 1.0 / math.sqrt(Dh)

    # torch Linear: y = x @ W^T + b.  Fold the softmax scale into W^T / b so the
    # kernel never multiplies the score matrix by 1/sqrt(Dh).
    wq_t = (wq.T * scale).astype(hidden_states.dtype)                # (D, D)
    bq_s = (bq * scale).astype(hidden_states.dtype).reshape(1, D)    # (1, D)

    # Generation-aware VMEM budget and query-tile cap.
    try:
        vmem_cap = int(pltpu.get_tpu_info().vmem_capacity_bytes)
    except Exception:
        vmem_cap = 64 << 20            # conservative fallback
    if vmem_cap <= (64 << 20):         # v7x-class parts: 64 MiB per TC
        max_q_tile = min(max_q_tile, 256)
    vmem_ceiling = (vmem_cap * 3) // 4

    TQ = _pick_q_tile(S, max_q_tile)
    num_q = pl.cdiv(S, TQ)
    TK = _pick_kv_tile(S, max_kv_tile)

    # Rough per-step VMEM footprint -> explicit scoped-VMEM limit with headroom.
    itemsize = jnp.dtype(hidden_states.dtype).itemsize
    vmem_est = (
        2 * TQ * D * itemsize          # hidden_states query rows (double-buffered)
        + 2 * S * GDh * itemsize       # K==V column slab (resident across q tiles)
        + 2 * D * GDh * itemsize       # query weight slab
        + 2 * GDh * itemsize           # query bias slab
        + 2 * TQ * GDh * itemsize      # output slab
        + TQ * GDh * 4                 # context scratch (f32)
        + TQ * TK * 4                  # live (TQ, TK) score/prob tile (f32)
        + 4 * TQ * GDh * 4             # q slab / online-softmax state (f32)
    )
    vmem_limit = int(min(max(2 * vmem_est, 32 << 20), vmem_ceiling))

    kernel = functools.partial(_attn_kernel, head_dim=Dh, group=G,
                               kv_tile=TK, kv_len=S)

    # Grid: (batch, head groups, query tiles); query-tile axis innermost so the
    # K==V slab, Wq columns and bq columns stay resident (not re-DMA'd) while
    # only the (1, TQ, D) query-row block changes per step.
    out = pl.pallas_call(
        kernel,
        out_shape=jax.ShapeDtypeStruct((B, S, D), hidden_states.dtype),
        grid_spec=pltpu.PrefetchScalarGridSpec(
            num_scalar_prefetch=0,
            grid=(B, H // G, num_q),
            in_specs=[
                pl.BlockSpec((1, TQ, D), lambda b, g, qi: (b, qi, 0)),   # Q rows
                pl.BlockSpec((1, S, GDh), lambda b, g, qi: (b, 0, g)),   # K==V cols
                pl.BlockSpec((D, GDh), lambda b, g, qi: (0, g)),         # Wq cols
                pl.BlockSpec((1, GDh), lambda b, g, qi: (0, g)),         # bq cols
            ],
            out_specs=pl.BlockSpec((1, TQ, GDh), lambda b, g, qi: (b, qi, g)),
            scratch_shapes=[pltpu.VMEM((TQ, GDh), jnp.float32)],
        ),
        compiler_params=pltpu.CompilerParams(
            dimension_semantics=("parallel", "parallel", "arbitrary"),
            vmem_limit_bytes=vmem_limit),
    )(hidden_states, hidden_states, wq_t, bq_s)

    return out  # already (B, S, D) == context_layer layout


def _reference(hidden_states, wq, bq, num_heads):
    B, S, D = hidden_states.shape
    H = num_heads
    Dh = D // H
    q = hidden_states @ wq.T + bq                                    # (B, S, D)
    q = q.reshape(B, S, H, Dh).transpose(0, 2, 1, 3)                 # (B, H, S, Dh)
    kv = hidden_states.reshape(B, S, H, Dh).transpose(0, 2, 1, 3)    # (B, H, S, Dh)
    scores = jnp.einsum('bhqd,bhkd->bhqk', q, kv) / math.sqrt(Dh)
    probs = jax.nn.softmax(scores, axis=-1)
    ctx = jnp.einsum('bhqk,bhkd->bhqd', probs, kv)
    return ctx.transpose(0, 2, 1, 3).reshape(B, S, D)


if __name__ == "__main__":
    key = jax.random.PRNGKey(0)

    # --- Test 1: module-sized config (hidden=32, heads=4, seq=8, batch=2) ---
    B, S, D, H = 2, 8, 32, 4
    k1, k2, k3, k4 = jax.random.split(key, 4)
    hidden_states = jax.random.normal(k1, (B, S, D), dtype=jnp.float32)
    # nn.Linear(hidden_size, all_head_size) -> weight (out, in) = (D, D), bias (D,)
    wq = jax.random.normal(k2, (D, D), dtype=jnp.float32) * 0.05
    bq = jax.random.normal(k3, (D,), dtype=jnp.float32) * 0.05

    out = attention_forward(hidden_states, wq, bq, H)
    out = jax.block_until_ready(out)
    ref = _reference(hidden_states, wq, bq, H)
    assert out.shape == (B, S, D)
    # approx=True reciprocal slightly loosens the tolerance vs the f32 reference.
    assert jnp.allclose(out, ref, atol=2e-2, rtol=2e-2), "mismatch vs reference (test 1)"

    # --- Test 2: exercise the reordered grid (multiple query tiles) and the
    #     online-softmax KV-chunk path with small forced tile sizes. ---
    B2, S2, D2, H2 = 1, 256, 128, 4
    j1, j2, j3 = jax.random.split(k4, 3)
    hs2 = jax.random.normal(j1, (B2, S2, D2), dtype=jnp.float32)
    wq2 = jax.random.normal(j2, (D2, D2), dtype=jnp.float32) * 0.05
    bq2 = jax.random.normal(j3, (D2,), dtype=jnp.float32) * 0.05

    out2 = attention_forward(hs2, wq2, bq2, H2, max_q_tile=128, max_kv_tile=128)
    out2 = jax.block_until_ready(out2)
    ref2 = _reference(hs2, wq2, bq2, H2)
    assert out2.shape == (B2, S2, D2)
    assert jnp.allclose(out2, ref2, atol=2e-2, rtol=2e-2), "mismatch vs reference (test 2)"

    print("KERNEL_OK")
</pallas_src>

<mosaic_0001>
module attributes {stable_mosaic.version = 11 : i64} {
  func.func @_attn_kernel(%arg0: i32, %arg1: i32, %arg2: i32, %arg3: memref<1x8x32xf32, #tpu.memory_space<vmem>>, %arg4: memref<1x8x32xf32, #tpu.memory_space<vmem>>, %arg5: memref<32x32xf32, #tpu.memory_space<vmem>>, %arg6: memref<1x32xf32, #tpu.memory_space<vmem>>, %arg7: memref<1x8x32xf32, #tpu.memory_space<vmem>>, %arg8: memref<8x32xf32, #tpu.memory_space<vmem>>) attributes {dimension_semantics = [#tpu.dimension_semantics<parallel>, #tpu.dimension_semantics<parallel>, #tpu.dimension_semantics<arbitrary>], iteration_bounds = array<i64: 2, 1, 1>, scalar_prefetch = 0 : i64, scratch_operands = 1 : i64, tpu.core_type = #tpu.core_type<tc>, window_params = [{transform_indices = @transform_0, window_bounds = array<i64: 1, 8, 32>}, {transform_indices = @transform_1, window_bounds = array<i64: 1, 8, 32>}, {transform_indices = @transform_2, window_bounds = array<i64: 32, 32>}, {transform_indices = @transform_3, window_bounds = array<i64: 1, 32>}, {transform_indices = @transform_4, window_bounds = array<i64: 1, 8, 32>}]} {
    %c0 = arith.constant 0 : index
    %c0_0 = arith.constant 0 : index
    %c0_1 = arith.constant 0 : index
    %0 = vector.load %arg3[%c0, %c0_0, %c0_1] : memref<1x8x32xf32, #tpu.memory_space<vmem>>, vector<1x8x32xf32>
    %1 = vector.shape_cast %0 : vector<1x8x32xf32> to vector<8x32xf32>
    %c0_2 = arith.constant 0 : index
    %c0_3 = arith.constant 0 : index
    %2 = vector.load %arg5[%c0_2, %c0_3] : memref<32x32xf32, #tpu.memory_space<vmem>>, vector<32x32xf32>
    %c0_4 = arith.constant 0 : index
    %c0_5 = arith.constant 0 : index
    %3 = vector.load %arg6[%c0_4, %c0_5] : memref<1x32xf32, #tpu.memory_space<vmem>>, vector<1x32xf32>
    %cst = arith.constant dense<0.000000e+00> : vector<8x32xf32>
    %4 = tpu.matmul %1, %2, %cst {dimension_numbers = #tpu.dot_dimension_numbers<[1], [0], [0], [1], [0, 0, 1, 1], [], []>} : vector<8x32xf32>, vector<32x32xf32>, vector<8x32xf32> -> vector<8x32xf32>
    %5 = vector.broadcast %3 : vector<1x32xf32> to vector<8x32xf32>
    %6 = arith.addf %4, %5 : vector<8x32xf32>
    %7 = vector.extract_strided_slice %6 {offsets = [0, 0], sizes = [8, 8], strides = [1, 1]} : vector<8x32xf32> to vector<8x8xf32>
    %8 = vector.extract_strided_slice %6 {offsets = [0, 8], sizes = [8, 8], strides = [1, 1]} : vector<8x32xf32> to vector<8x8xf32>
    %9 = vector.extract_strided_slice %6 {offsets = [0, 16], sizes = [8, 8], strides = [1, 1]} : vector<8x32xf32> to vector<8x8xf32>
    %10 = vector.extract_strided_slice %6 {offsets = [0, 24], sizes = [8, 8], strides = [1, 1]} : vector<8x32xf32> to vector<8x8xf32>
    %c0_6 = arith.constant 0 : index
    %c0_7 = arith.constant 0 : index
    %c0_8 = arith.constant 0 : index
    %11 = vector.load %arg4[%c0_6, %c0_7, %c0_8] : memref<1x8x32xf32, #tpu.memory_space<vmem>>, vector<1x8x32xf32>
    %12 = vector.shape_cast %11 : vector<1x8x32xf32> to vector<8x32xf32>
    %13 = vector.extract_strided_slice %12 {offsets = [0, 0], sizes = [8, 8], strides = [1, 1]} : vector<8x32xf32> to vector<8x8xf32>
    %cst_9 = arith.constant dense<0.000000e+00> : vector<8x8xf32>
    %14 = tpu.matmul %7, %13, %cst_9 {dimension_numbers = #tpu.dot_dimension_numbers<[1], [1], [0], [0], [0, 0, 1, 0], [], []>} : vector<8x8xf32>, vector<8x8xf32>, vector<8x8xf32> -> vector<8x8xf32>
    %cst_10 = arith.constant dense<0xFF800000> : vector<8xf32>
    %15 = vector.multi_reduction <maximumf>, %14, %cst_10 [1] : vector<8x8xf32> to vector<8xf32>
    %16 = vector.shape_cast %15 : vector<8xf32> to vector<8x1xf32>
    %17 = vector.broadcast %16 : vector<8x1xf32> to vector<8x8xf32>
    %18 = arith.subf %14, %17 : vector<8x8xf32>
    %19 = math.exp %18 : vector<8x8xf32>
    %cst_11 = arith.constant dense<0.000000e+00> : vector<8xf32>
    %20 = vector.multi_reduction <add>, %19, %cst_11 [1] : vector<8x8xf32> to vector<8xf32>
    %21 = vector.shape_cast %20 : vector<8xf32> to vector<8x1xf32>
    %22 = tpu.reciprocal %21 {approx = true} : vector<8x1xf32> -> vector<8x1xf32>
    %cst_12 = arith.constant dense<0.000000e+00> : vector<8x8xf32>
    %23 = tpu.matmul %19, %13, %cst_12 {dimension_numbers = #tpu.dot_dimension_numbers<[1], [0], [0], [1], [0, 0, 1, 1], [], []>} : vector<8x8xf32>, vector<8x8xf32>, vector<8x8xf32> -> vector<8x8xf32>
    %24 = vector.broadcast %22 : vector<8x1xf32> to vector<8x8xf32>
    %25 = arith.mulf %23, %24 : vector<8x8xf32>
    %c0_13 = arith.constant 0 : index
    %c0_14 = arith.constant 0 : index
    %26 = vector.load %arg8[%c0_13, %c0_14] : memref<8x32xf32, #tpu.memory_space<vmem>>, vector<8x8xf32>
    tpu.vector_store %arg8[%c0_13, %c0_14], %25 {strides = array<i32>} : memref<8x32xf32, #tpu.memory_space<vmem>>, vector<8x8xf32>,
    %27 = vector.extract_strided_slice %12 {offsets = [0, 8], sizes = [8, 8], strides = [1, 1]} : vector<8x32xf32> to vector<8x8xf32>
    %cst_15 = arith.constant dense<0.000000e+00> : vector<8x8xf32>
    %28 = tpu.matmul %8, %27, %cst_15 {dimension_numbers = #tpu.dot_dimension_numbers<[1], [1], [0], [0], [0, 0, 1, 0], [], []>} : vector<8x8xf32>, vector<8x8xf32>, vector<8x8xf32> -> vector<8x8xf32>
    %cst_16 = arith.constant dense<0xFF800000> : vector<8xf32>
    %29 = vector.multi_reduction <maximumf>, %28, %cst_16 [1] : vector<8x8xf32> to vector<8xf32>
    %30 = vector.shape_cast %29 : vector<8xf32> to vector<8x1xf32>
    %31 = vector.broadcast %30 : vector<8x1xf32> to vector<8x8xf32>
    %32 = arith.subf %28, %31 : vector<8x8xf32>
    %33 = math.exp %32 : vector<8x8xf32>
    %cst_17 = arith.constant dense<0.000000e+00> : vector<8xf32>
    %34 = vector.multi_reduction <add>, %33, %cst_17 [1] : vector<8x8xf32> to vector<8xf32>
    %35 = vector.shape_cast %34 : vector<8xf32> to vector<8x1xf32>
    %36 = tpu.reciprocal %35 {approx = true} : vector<8x1xf32> -> vector<8x1xf32>
    %cst_18 = arith.constant dense<0.000000e+00> : vector<8x8xf32>
    %37 = tpu.matmul %33, %27, %cst_18 {dimension_numbers = #tpu.dot_dimension_numbers<[1], [0], [0], [1], [0, 0, 1, 1], [], []>} : vector<8x8xf32>, vector<8x8xf32>, vector<8x8xf32> -> vector<8x8xf32>
    %38 = vector.broadcast %36 : vector<8x1xf32> to vector<8x8xf32>
    %39 = arith.mulf %37, %38 : vector<8x8xf32>
    %c0_19 = arith.constant 0 : index
    %c8 = arith.constant 8 : index
    %40 = vector.load %arg8[%c0_19, %c8] : memref<8x32xf32, #tpu.memory_space<vmem>>, vector<8x8xf32>
    tpu.vector_store %arg8[%c0_19, %c8], %39 {strides = array<i32>} : memref<8x32xf32, #tpu.memory_space<vmem>>, vector<8x8xf32>,
    %41 = vector.extract_strided_slice %12 {offsets = [0, 16], sizes = [8, 8], strides = [1, 1]} : vector<8x32xf32> to vector<8x8xf32>
    %cst_20 = arith.constant dense<0.000000e+00> : vector<8x8xf32>
    %42 = tpu.matmul %9, %41, %cst_20 {dimension_numbers = #tpu.dot_dimension_numbers<[1], [1], [0], [0], [0, 0, 1, 0], [], []>} : vector<8x8xf32>, vector<8x8xf32>, vector<8x8xf32> -> vector<8x8xf32>
    %cst_21 = arith.constant dense<0xFF800000> : vector<8xf32>
    %43 = vector.multi_reduction <maximumf>, %42, %cst_21 [1] : vector<8x8xf32> to vector<8xf32>
    %44 = vector.shape_cast %43 : vector<8xf32> to vector<8x1xf32>
    %45 = vector.broadcast %44 : vector<8x1xf32> to vector<8x8xf32>
    %46 = arith.subf %42, %45 : vector<8x8xf32>
    %47 = math.exp %46 : vector<8x8xf32>
    %cst_22 = arith.constant dense<0.000000e+00> : vector<8xf32>
    %48 = vector.multi_reduction <add>, %47, %cst_22 [1] : vector<8x8xf32> to vector<8xf32>
    %49 = vector.shape_cast %48 : vector<8xf32> to vector<8x1xf32>
    %50 = tpu.reciprocal %49 {approx = true} : vector<8x1xf32> -> vector<8x1xf32>
    %cst_23 = arith.constant dense<0.000000e+00> : vector<8x8xf32>
    %51 = tpu.matmul %47, %41, %cst_23 {dimension_numbers = #tpu.dot_dimension_numbers<[1], [0], [0], [1], [0, 0, 1, 1], [], []>} : vector<8x8xf32>, vector<8x8xf32>, vector<8x8xf32> -> vector<8x8xf32>
    %52 = vector.broadcast %50 : vector<8x1xf32> to vector<8x8xf32>
    %53 = arith.mulf %51, %52 : vector<8x8xf32>
    %c0_24 = arith.constant 0 : index
    %c16 = arith.constant 16 : index
    %54 = vector.load %arg8[%c0_24, %c16] : memref<8x32xf32, #tpu.memory_space<vmem>>, vector<8x8xf32>
    tpu.vector_store %arg8[%c0_24, %c16], %53 {strides = array<i32>} : memref<8x32xf32, #tpu.memory_space<vmem>>, vector<8x8xf32>,
    %55 = vector.extract_strided_slice %12 {offsets = [0, 24], sizes = [8, 8], strides = [1, 1]} : vector<8x32xf32> to vector<8x8xf32>
    %cst_25 = arith.constant dense<0.000000e+00> : vector<8x8xf32>
    %56 = tpu.matmul %10, %55, %cst_25 {dimension_numbers = #tpu.dot_dimension_numbers<[1], [1], [0], [0], [0, 0, 1, 0], [], []>} : vector<8x8xf32>, vector<8x8xf32>, vector<8x8xf32> -> vector<8x8xf32>
    %cst_26 = arith.constant dense<0xFF800000> : vector<8xf32>
    %57 = vector.multi_reduction <maximumf>, %56, %cst_26 [1] : vector<8x8xf32> to vector<8xf32>
    %58 = vector.shape_cast %57 : vector<8xf32> to vector<8x1xf32>
    %59 = vector.broadcast %58 : vector<8x1xf32> to vector<8x8xf32>
    %60 = arith.subf %56, %59 : vector<8x8xf32>
    %61 = math.exp %60 : vector<8x8xf32>
    %cst_27 = arith.constant dense<0.000000e+00> : vector<8xf32>
    %62 = vector.multi_reduction <add>, %61, %cst_27 [1] : vector<8x8xf32> to vector<8xf32>
    %63 = vector.shape_cast %62 : vector<8xf32> to vector<8x1xf32>
    %64 = tpu.reciprocal %63 {approx = true} : vector<8x1xf32> -> vector<8x1xf32>
    %cst_28 = arith.constant dense<0.000000e+00> : vector<8x8xf32>
    %65 = tpu.matmul %61, %55, %cst_28 {dimension_numbers = #tpu.dot_dimension_numbers<[1], [0], [0], [1], [0, 0, 1, 1], [], []>} : vector<8x8xf32>, vector<8x8xf32>, vector<8x8xf32> -> vector<8x8xf32>
    %66 = vector.broadcast %64 : vector<8x1xf32> to vector<8x8xf32>
    %67 = arith.mulf %65, %66 : vector<8x8xf32>
    %c0_29 = arith.constant 0 : index
    %c24 = arith.constant 24 : index
    %68 = vector.load %arg8[%c0_29, %c24] : memref<8x32xf32, #tpu.memory_space<vmem>>, vector<8x8xf32>
    tpu.vector_store %arg8[%c0_29, %c24], %67 {strides = array<i32>} : memref<8x32xf32, #tpu.memory_space<vmem>>, vector<8x8xf32>,
    %c0_30 = arith.constant 0 : index
    %c0_31 = arith.constant 0 : index
    %69 = vector.load %arg8[%c0_30, %c0_31] : memref<8x32xf32, #tpu.memory_space<vmem>>, vector<8x32xf32>
    %c0_32 = arith.constant 0 : index
    %c0_33 = arith.constant 0 : index
    %c0_34 = arith.constant 0 : index
    %70 = vector.load %arg7[%c0_32, %c0_33, %c0_34] : memref<1x8x32xf32, #tpu.memory_space<vmem>>, vector<1x8x32xf32>
    %71 = vector.shape_cast %70 : vector<1x8x32xf32> to vector<8x32xf32>
    %72 = vector.shape_cast %69 : vector<8x32xf32> to vector<1x8x32xf32>
    tpu.vector_store %arg7[%c0_32, %c0_33, %c0_34], %72 {strides = array<i32>} : memref<1x8x32xf32, #tpu.memory_space<vmem>>, vector<1x8x32xf32>,
    return
  }
  func.func @transform_0(%arg0: i32, %arg1: i32, %arg2: i32) -> (i32, i32, i32) {
    %c0_i32 = arith.constant 0 : i32
    %c0_i32_0 = arith.constant 0 : i32
    return %arg0, %arg2, %c0_i32 : i32, i32, i32
  }
  func.func @transform_1(%arg0: i32, %arg1: i32, %arg2: i32) -> (i32, i32, i32) {
    %c0_i32 = arith.constant 0 : i32
    %c0_i32_0 = arith.constant 0 : i32
    return %arg0, %c0_i32, %arg1 : i32, i32, i32
  }
  func.func @transform_2(%arg0: i32, %arg1: i32, %arg2: i32) -> (i32, i32) {
    %c0_i32 = arith.constant 0 : i32
    %c0_i32_0 = arith.constant 0 : i32
    return %c0_i32, %arg1 : i32, i32
  }
  func.func @transform_3(%arg0: i32, %arg1: i32, %arg2: i32) -> (i32, i32) {
    %c0_i32 = arith.constant 0 : i32
    %c0_i32_0 = arith.constant 0 : i32
    return %c0_i32, %arg1 : i32, i32
  }
  func.func @transform_4(%arg0: i32, %arg1: i32, %arg2: i32) -> (i32, i32, i32) {
    %c0_i32 = arith.constant 0 : i32
    return %arg0, %arg2, %arg1 : i32, i32, i32
  }
}

</mosaic_0001>

<bundles_post_ra>
// kernel: tpu_custom_call.1
= control target key start
LH: loop header
LB: loop body
LE: loop exit
PB: predicated region body
PF: predicated region fallthrough
CT: control target
= control target key end

     0   :  { %s1960_s0 = inlined_call_operand.hbm [shape: f32[2,8,32], index: 0, kind: input, shape index: {}]   ;;  %s1961_s1 = inlined_call_operand.hbm [shape: f32[2,8,32], index: 1, kind: input, shape index: {}]   ;;  %s1962_s2 = inlined_call_operand.hbm [shape: f32[32,32], index: 2, kind: input, shape index: {}]   ;;  %s1963_s3 = inlined_call_operand.vmem [shape: f32[1,32], index: 3, kind: input, shape index: {}]   ;;  %s1964_s4 = inlined_call_operand.hbm [shape: f32[2,8,32], index: 4, kind: output, shape index: {}]  }
   0x1   :  { %1971 = sst [smem:[#allocation16_spill]] %s1962_s2 }
   0x2   :  { %9 = vsyncpa [#allocation4], 0 }
   0x3   :  { %11 = vsyncpa [#allocation4 + $0x1], 0 }
   0x4   :  { %12 = vsyncpa [#allocation7], 0 }
   0x5   :  { %14 = vsyncpa [#allocation7 + $0x1], 0 }
   0x6   :  { %15 = vsyncpa [#allocation5], 0 }
   0x7   :  { %17 = vsyncpa [#allocation5 + $0x1], 0  ;;  %s1655_s15 = smov 0   ;;  %s1657_s16 = smov 0  }
   0x8   :  { %s1659_s17 = smov 0   ;;  %s1661_s18 = smov 0  }
   0x9   :  { %s1663_s19 = smov 0   ;;  %s1665_s20 = smov 0  }
   0xa LB: > { %1972 = sst [smem:[#allocation14_spill]] %s1609_s19  ;;  %s1686_s21 = sadd.s32 4294967295, %s1613_s20   ;;  %s1613_s20 = sphi %s1665_s20, %s23_s20   ;;  %s1609_s19 = sphi %s1663_s19, %s1991_s19   ;;  %s1605_s18 = sphi %s1661_s18, %s1990_s18   ;;  %s1601_s17 = sphi %s1659_s17, %s1994_s17   ;;  %s1597_s16 = sphi %s1657_s16, %s1993_s16   ;;  %s1593_s15 = sphi %s1655_s15, %s1992_s15  }
   0xb   : > { %s1220_s22 = sadd.s32 4294967294, %s1613_s20   ;;  %p64_p0 = scmp.ne.s32.totalorder %s1597_s16, %s1593_s15 }
   0xc   : > { %p1965_p1 = scmp.eq.s32.totalorder %s1686_s21, 0  ;;  %p178_p3 = scmp.eq.s32.totalorder %s1220_s22, 1 }
   0xd   : > { %p1221_p5 = scmp.ge.s32.totalorder %s1613_s20, 1  ;;  %p185_p7 = scmp.lt.s32.totalorder %s1613_s20, 3 }
   0xe   : > { %p1695_p4 = por %p1965_p1, %p64_p0  ;;  %p1700_p6 = por %p178_p3, %p64_p0 }
   0xf   : > { %p1705_p8 = pnand %p1221_p5, %p185_p7  ;;  %s1615_s26 = smov [#allocation8]  }
  0x10   : > { %s1973_s23 = scalar_select %p1695_p4, 1, 0 }
  0x11   : > { %s1974_s24 = scalar_select %p1700_p6, 1, 0 }
  0x12   : > { %s1975_s25 = scalar_select %p1705_p8, 1, 0 }
  0x13   : > { %s199_s27 = sshll.u32 %s1615_s26, 4  ;;  %p1340_p9 = pneg %p1705_p8  ;;  %s200_s27 = int_to_ptr.vmem [resolvable:$true] %s199_s27 }
  0x14   : > { %s42_s29 = sadd.s32 1, %s1609_s19  ;;  %s1977_s2 = sld [smem:[#allocation16_spill]] }
  0x15   : > { %p1714_p11 = pnand %p1340_p9, %p1965_p1 }
  0x17   : > { %p1437_p13 = pneg %p1714_p11 }
  0x1a   : > { %s1435_s6 = scalar_lea.hbm %s1977_s2, 512 }
  0x1b   : > { %p1436_p12 = scmp.ne.s32.totalorder %s1977_s2, %s1435_s6  ;;  %p1442_p5 = scmp.lt.u32.totalorder %s1435_s6, %s1977_s2 }
  0x1d   : > { %p1438_p0 = pnand %p1437_p13, %p1436_p12 }
  0x1f   : > { %p1439_p3 = pneg %p1438_p0 }
  0x21   : > { %p1444_p7 = pnand %p1442_p5, %p1439_p3 }
  0x23   : > { %1447 = shalt.err (!%p1444_p7)
}
  0x24   : > { %s1448_s11 = scalar_lea.vmem %s200_s27, 512  ;;  %p1456_p2 = scmp.lt.s32.totalorder %s200_s27, %s200_s27 }
  0x25   : > { %p1449_p9 = scmp.ne.s32.totalorder %s200_s27, %s1448_s11  ;;  %p1457_p6 = scmp.lt.s32.totalorder %s1448_s11, %s1448_s11 }
  0x27   : > { %p1451_p10 = pnand %p1449_p9, %p1437_p13  ;;  %p1458_p4 = por %p1457_p6, %p1456_p2 }
  0x29   : > { %p1452_p1 = pneg %p1451_p10 }
  0x2b   : > { %p1459_p8 = pnand %p1458_p4, %p1452_p1 }
  0x2d   : > { %1462 = shalt.err (!%p1459_p8)
}
  0x2e   : > { %s1616_s12 = smov 128   ;;  %s1617_s13 = smov 8  }
  0x2f   : > { %1343 = dma.hbm_to_vmem [thread:$0]  (!%p1714_p11), %s1977_s2, 512, %s200_s27, [#allocation7], %s1616_s12, %s1616_s12, %s1617_s13  }
  0x30   : > { %p44_p1 = scmp.ge.s32.totalorder %s42_s29, 2  ;;  %s51_s26 = sadd.s32 1, %s1601_s17 }
  0x31   : > { %p58_p2 = scmp.ne.s32.totalorder %s1601_s17, %s1597_s16  ;;  %p59_p4 = scmp.eq.s32.totalorder %s1613_s20, 0 }
  0x32   : > { %s1996_s29 = smov (%p44_p1, %s42_s29), 0  ;;  %p1980_p8 = scmp.eq.s32.totalorder %s1686_s21, 1 }
  0x33   : > { %1978 = sst [smem:[#allocation15_spill]] %s1996_s29  ;;  %p1741_p6 = por %p59_p4, %p58_p2 }
  0x34   : > { %p1747_p10 = por %p1980_p8, %p58_p2  ;;  %s46_s5 = ssub.s32 %s1609_s19, %s1996_s29 }
  0x35   : > { %p1356_p11 = scmp.lt.s32.totalorder %s1613_s20, 2  ;;  %p49_p12 = scmp.eq.s32.totalorder %s46_s5, 0 }
  0x36   : > { %s1981_s28 = scalar_select %p1747_p10, 1, 0 }
  0x37   : > { %s219_s27 = sand.u32 1, %s1601_s17   ;;  %s1226_s8 = sshll.u32 %s1609_s19, 7 }
  0x38   : > { %s1755_s6 = sshll.u32 %s219_s27, 3  ;;  %s1764_s11 = scalar_lea.hbm %s1960_s0, %s1226_s8 }
  0x39   : > { %s1758_s7 = scalar_select %p49_p12, %s1601_s17, %s51_s26  }
  0x3a   : > { %s223_s12 = scalar_lea.vmem [#allocation3], %s1755_s6  ;;  %p1771_p13 = pnand %p1356_p11, %p1741_p6 }
  0x3b   : > { %s231_s13 = sshll.u32 %s223_s12, 4  ;;  %s1778_s5 = scalar_lea.hbm %s1961_s1, %s1226_s8  ;;  %s1767_s13 = int_to_ptr.vmem [resolvable:$true] %s231_s13 }
  0x3c   : > { %s238_s9 = sand.u32 1, %s1613_s20   ;;  %s220_s10 = scalar_lea.sflag [#allocation4], %s219_s27 }
  0x3d   : > { %s1463_s2 = scalar_lea.hbm %s1764_s11, 128  ;;  %p1465_p3 = pneg %p1771_p13 }
  0x3e   : > { %p1464_p0 = scmp.ne.s32.totalorder %s1764_s11, %s1463_s2  ;;  %s1468_s29 = scalar_lea.hbm %s1960_s0, 256 }
  0x3f   : > { %p1469_p9 = scmp.lt.u32.totalorder %s1764_s11, %s1960_s0  ;;  %p1470_p1 = scmp.lt.u32.totalorder %s1468_s29, %s1463_s2 }
  0x40   : > { %p1466_p5 = pnand %p1465_p3, %p1464_p0  ;;  %p1472_p4 = scmp.lt.u32.totalorder %s1463_s2, %s1764_s11 }
  0x41   : > { %p1471_p2 = por %p1470_p1, %p1469_p9 }
  0x42   : > { %p1467_p7 = pneg %p1466_p5 }
  0x43   : > { %p1473_p6 = por %p1472_p4, %p1471_p2 }
  0x45   : > { %p1474_p8 = pnand %p1473_p6, %p1467_p7 }
  0x47   : > { %1477 = shalt.err (!%p1474_p8)
}
  0x48   : > { %s1478_s27 = scalar_lea.vmem %s1767_s13, 128  ;;  %s1618_s8 = smov [#allocation3]  }
  0x49   : > { %p1479_p11 = scmp.ne.s32.totalorder %s1767_s13, %s1478_s27  ;;  %s1483_s26 = sshll.u32 %s1618_s8, 4  ;;  %s1484_s26 = int_to_ptr.vmem [resolvable:$false] %s1483_s26 }
  0x4a   : > { %s1485_s19 = scalar_lea.vmem %s1484_s26, 256  ;;  %p1486_p5 = scmp.lt.s32.totalorder %s1767_s13, %s1484_s26 }
  0x4b   : > { %p1481_p12 = pnand %p1479_p11, %p1465_p3  ;;  %p1487_p9 = scmp.lt.s32.totalorder %s1485_s19, %s1478_s27 }
  0x4d   : > { %p1482_p0 = pneg %p1481_p12  ;;  %p1488_p1 = por %p1487_p9, %p1486_p5 }
  0x4f   : > { %p1489_p2 = pnand %p1488_p1, %p1482_p0 }
  0x51   : > { %1492 = shalt.err (!%p1489_p2)
}
  0x52   : > { %1347 = dma.hbm_to_vmem [thread:$0]  (!%p1771_p13), %s1764_s11, 128, %s1767_s13, %s220_s10  }
  0x53   : > { %s242_s2 = scalar_lea.vmem [#allocation6], %s1755_s6  ;;  %s239_s30 = scalar_lea.sflag [#allocation7], %s238_s9 }
  0x54   : > { %s250_s29 = sshll.u32 %s242_s2, 4  ;;  %s1493_s12 = scalar_lea.hbm %s1778_s5, 128  ;;  %s251_s29 = int_to_ptr.vmem [resolvable:$true] %s250_s29 }
  0x55   : > { %p1494_p7 = scmp.ne.s32.totalorder %s1778_s5, %s1493_s12  ;;  %s1498_s8 = scalar_lea.hbm %s1961_s1, 256 }
  0x56   : > { %p1499_p8 = scmp.lt.u32.totalorder %s1778_s5, %s1961_s1  ;;  %p1500_p11 = scmp.lt.u32.totalorder %s1498_s8, %s1493_s12 }
  0x57   : > { %p1496_p4 = pnand %p1494_p7, %p1465_p3  ;;  %p1502_p0 = scmp.lt.u32.totalorder %s1493_s12, %s1778_s5 }
  0x58   : > { %p1501_p12 = por %p1500_p11, %p1499_p8 }
  0x59   : > { %p1497_p6 = pneg %p1496_p4 }
  0x5a   : > { %p1503_p5 = por %p1502_p0, %p1501_p12 }
  0x5c   : > { %p1504_p9 = pnand %p1503_p5, %p1497_p6 }
  0x5e   : > { %1507 = shalt.err (!%p1504_p9)
}
  0x5f   : > { %s1508_s6 = scalar_lea.vmem %s251_s29, 128  ;;  %s1619_s11 = smov [#allocation6]  }
  0x60   : > { %p1509_p1 = scmp.ne.s32.totalorder %s251_s29, %s1508_s6  ;;  %s1513_s13 = sshll.u32 %s1619_s11, 4  ;;  %s1514_s13 = int_to_ptr.vmem [resolvable:$false] %s1513_s13 }
  0x61   : > { %s1515_s9 = scalar_lea.vmem %s1514_s13, 256  ;;  %p1516_p4 = scmp.lt.s32.totalorder %s251_s29, %s1514_s13 }
  0x62   : > { %p1511_p2 = pnand %p1509_p1, %p1465_p3  ;;  %p1517_p10 = scmp.lt.s32.totalorder %s1515_s9, %s1508_s6 }
  0x64   : > { %p1512_p7 = pneg %p1511_p2  ;;  %p1518_p8 = por %p1517_p10, %p1516_p4 }
  0x66   : > { %p1519_p11 = pnand %p1518_p8, %p1512_p7 }
  0x68   : > { %1522 = shalt.err (!%p1519_p11)
}
  0x69   : > { %1350 = dma.hbm_to_vmem [thread:$0]  (!%p1771_p13), %s1778_s5, 128, %s251_s29, %s239_s30  }
  0x6a   : > { %p1983_p6 = scmp.ne.s32.totalorder %s1975_s25, 0 }
  0x6b   : > { %s1831_s10 = sand.u32 (!%p1983_p6), 1, %s1597_s16   ;;  %p1984_p10 = scmp.ne.s32.totalorder (!%p1983_p6), %s1973_s23, 0 }
  0x6c   : > { %259 = sbr.rel (%p1983_p6) target bundleno = 1191 (0x4a7), region = 36  ;;  %s1834_s2 = sshll.u32 (!%p1983_p6), %s1831_s10, 3 }
  0x6d   : > { %s262_s12 = scalar_lea.sflag (!%p1983_p6), [#allocation4], %s1831_s10  ;;  %s265_s22 = scalar_lea.vmem (!%p1983_p6), [#allocation3], %s1834_s2 }
  0x73   : > { %1576 = dma.done.wait (%p1984_p10), %s262_s12, 128  }
  0x74   : > { %1578 = vsyncadd (%p1984_p10), %s262_s12, 4294967168  ;;  %s270_s25 = sand.u32 1, %s1686_s21   ;;  %s274_s5 = scalar_lea.vmem [#allocation6], %s1834_s2 }
  0x75   : > { %s271_s14 = scalar_lea.sflag [#allocation7], %s270_s25 }
  0x76   : > { %1580 = dma.done.wait (%p1984_p10), %s271_s14, 128  }
  0x77   : > { %1582 = vsyncadd (%p1984_p10), %s271_s14, 4294967168  ;;  %p1985_p13 = scmp.eq.s32.totalorder %s1686_s21, 0 }
  0x79   : > { %1584 = dma.done.wait (%p1985_p13), [#allocation7], 512   ;;  %p1986_p3 = pmov %p1985_p13 }
  0x7a   : > { %v1620_v0 = vmov 0.0|0.0   ;;  %vm1621_vm0 = vmmov 0   ;;  %v1622_v1 = vmov 0.0   ;;  %v315_v2 = vld [vmem:[#allocation8] sm:$0xff]  ;;  %v316_v3 = vld [vmem:[#allocation8 + $0x8] sm:$0xff]  ;;  %v317_v4 = vld [vmem:[#allocation8 + $0x10] sm:$0xff] }
  0x7b   : > { %1586 = vsyncadd (%p1986_p3), [#allocation7], 4294966784  ;;  %1324 = vmatprep.subr.bf16.mxu0 %v1620_v0  ;;  %1281 = vmatprep.mubr.msk.f32.mxu0 %vm1621_vm0, %v1622_v1  ;;  %v1325_v5 = vpack.c.bf16 %v316_v3, %v315_v2  ;;  %v318_v6 = vld [vmem:[#allocation8 + $0x18] sm:$0xff]  ;;  %s1623_s21 = smov 112   ;;  %s1624_s23 = smov 120   ;;  %v314_v9 = vld [vmem:[%s265_s22] sm:$0xff] }
  0x7c   : > { %1284 = vmatprep.subr.mxu1 %v1622_v1  ;;  %1286 = vmatprep.mubr.msk.f32.mxu1 %vm1621_vm0, %v1622_v1  ;;  %v400_v7 = vld [vmem:[%s274_s5] sm:$0xff]  ;;  %v1328_v8 = vpack.c.bf16 %v318_v6, %v317_v4  ;;  %vm326_vm1 = vcmask 261120   ;;  %vm401_vm2 = vcmask 64512   ;;  %s1625_s27 = smov 104   ;;  %s1626_s8 = smov 8   ;;  %vm730_vm3 = vcmask 130112  }
  0x7d   : > { %734 = vrot.lane.b32.xlu1 %v400_v7, %s1623_s21  ;;  %565 = vrot.lane.b32.xlu0 %v400_v7, %s1624_s23  ;;  %v1234_v11 = vld [vmem:[%s1963_s3] ss:$0 sm:$0xff]  ;;  %s1627_s26 = smov 16   ;;  %s1628_s19 = smov 24   ;;  %vm899_vm4 = vcmask 195712   ;;  %vm1068_vm5 = vcmask 261312  }
  0x7e   : > { %1326 = vmatpush3.bf16.msra.mxu0 %v1325_v5  ;;  %1285 = vmatpush3.xpose.msk.msra.mxu1 %vm401_vm2, %v400_v7  ;;  %s1249_s6 = sshll.u32 %s1605_s18, 7  ;;  %s310_s11 = scalar_lea.vmem [#allocation9], %s1834_s2 }
  0x7f   : > { %1327 = vmatprep.subr.bf16.mxu0 %v1620_v0  ;;  %1289 = vmatprep.subr.mxu1 %v1622_v1  ;;  %s1088_s13 = sshll.u32 %s310_s11, 4  ;;  %s1910_s22 = scalar_lea.hbm %s1964_s4, %s1249_s6  ;;  %s1912_s13 = int_to_ptr.vmem [resolvable:$true] %s1088_s13 }
  0x80   : > { %s1073_s25 = scalar_lea.sflag [#allocation5], %s1831_s10  ;;  %s1523_s14 = scalar_lea.vmem %s1912_s13, 128 }
  0x81   : > { %p1524_p12 = scmp.ne.s32.totalorder %s1912_s13, %s1523_s14  ;;  %p1987_p0 = scmp.ne.s32.totalorder %s1981_s28, 0 }
  0x82   : > { %1329 = vmatpush3.bf16.msra.mxu0 %v1328_v8  ;;  %s1629_s18 = smov [#allocation9]  }
  0x83   : > { %1294 = vmatprep.subr.mxu0 %v1622_v1  ;;  %p1525_p5 = pnand %p1524_p12, %p1987_p0  ;;  %s1527_s2 = sshll.u32 %s1629_s18, 4  ;;  %s1528_s2 = int_to_ptr.vmem [resolvable:$false] %s1527_s2 }
  0x84   : > { %s1529_s5 = scalar_lea.vmem %s1528_s2, 256  ;;  %p1530_p1 = scmp.lt.s32.totalorder %s1912_s13, %s1528_s2 }
  0x85   : > { %1282 = vmatmul.mubr.msk.f32.vlgmr.msra.gmra.mrb[0].mxu0 %vm326_vm1, %v314_v9  ;;  %p1526_p9 = pneg %p1525_p5  ;;  %p1531_p2 = scmp.lt.s32.totalorder %s1529_s5, %s1523_s14 }
  0x86   : > { %1296 = vmatprep.mubr.msk.f32.mxu0 %vm1621_vm0, %v1622_v1 }
  0x87   : > { %p1532_p7 = por %p1531_p2, %p1530_p1 }
  0x89   : > { %p1533_p4 = pnand %p1532_p7, %p1526_p9 }
  0xef   : > { %v566_v10 = vpop.permute.xlu0 %565  ;;  %v735_v15 = vpop.permute.xlu1 %734 }
  0xf0   : > { %1295 = vmatpush3.xpose.msk.msra.mxu0 %vm401_vm2, %v566_v10 }
  0xf1   : > { %1304 = vmatprep.subr.mxu0 %v1622_v1 }
 0x158   : > { %v396_v12 = vpop.f32.mrb[0].mxu0 }
 0x159   : > { %v397_v13 = vadd.f32 %v1234_v11, %v396_v12  ;;  %v1283_v14 = vpop.f32.mrb[1].mxu0 }
 0x15b   : > { %732 = vrot.lane.b32.xlu1 %v397_v13, %s1623_s21  ;;  %563 = vrot.lane.b32.xlu0 %v397_v13, %s1624_s23 }
 0x15c   : > { %1287 = vmatmul.mubr.msk.f32.vlgmr.msra.gmra.mrb[0].mxu1 %vm401_vm2, %v397_v13 }
 0x15d   : > { %1290 = vmatpush3.msra.mxu1 %v400_v7  ;;  %1291 = vmatprep.mubr.msk.f32.mxu1 %vm1621_vm0, %v1622_v1 }
 0x15e   : > { %1299 = vmatprep.subr.mxu1 %v1622_v1 }
 0x15f   : > { %901 = vrot.lane.b32.xlu1 %v397_v13, %s1625_s27  ;;  %903 = vrot.lane.b32.xlu0 %v400_v7, %s1625_s27 }
 0x1cd   : > { %v564_v16 = vpop.permute.xlu0 %563  ;;  %v733_v17 = vpop.permute.xlu1 %732 }
 0x1ce   : > { %1297 = vmatmul.mubr.msk.f32.vlgmr.msra.gmra.mrb[2].mxu0 %vm401_vm2, %v564_v16 }
 0x1cf   : > { %1305 = vmatpush3.xpose.msk.msra.mxu0 %vm401_vm2, %v735_v15  ;;  %1306 = vmatprep.mubr.msk.f32.mxu0 %vm1621_vm0, %v1622_v1 }
 0x1d0   : > { %1314 = vmatprep.subr.mxu0 %v1622_v1 }
 0x1d1   : > { %v904_v18 = vpop.permute.xlu0 %903  ;;  %v902_v19 = vpop.permute.xlu1 %901 }
 0x1d2   : > { %1307 = vmatmul.mubr.msk.f32.vlgmr.msra.gmra.mrb[4].mxu0 %vm401_vm2, %v733_v17 }
 0x1d3   : > { %1315 = vmatpush3.xpose.msk.msra.mxu0 %vm401_vm2, %v904_v18  ;;  %1316 = vmatprep.mubr.msk.f32.mxu0 %vm1621_vm0, %v1622_v1 }
 0x1d6   : > { %1317 = vmatmul.mubr.msk.f32.vlgmr.msra.gmra.mrb[6].mxu0 %vm401_vm2, %v902_v19 }
 0x22f   : > { %v474_v20 = vpop.f32.mrb[0].mxu1 }
 0x230   : > { %v1288_v21 = vpop.f32.mrb[1].mxu1  ;;  %v478_v22 = vsel %vm401_vm2, %v474_v20, -inf }
 0x231   : > { %479 = vmax.xlane.f32.xlu0 %v478_v22 }
 0x2a1   : > { %v637_v23 = vpop.f32.mrb[2].mxu0 }
 0x2a2   : > { %v1298_v24 = vpop.f32.mrb[3].mxu0  ;;  %v641_v25 = vsel %vm401_vm2, %v637_v23, -inf }
 0x2a3   : > { %642 = vmax.xlane.f32.xlu1 %v641_v25 }
 0x2a5   : > { %v806_v26 = vpop.f32.mrb[4].mxu0 }
 0x2a6   : > { %v1308_v27 = vpop.f32.mrb[5].mxu0  ;;  %v810_v28 = vsel %vm401_vm2, %v806_v26, -inf }
 0x2a7   : > { %811 = vmax.xlane.f32.xlu0 %v810_v28 }
 0x2a9   : > { %v975_v29 = vpop.f32.mrb[6].mxu0 }
 0x2aa   : > { %v1318_v30 = vpop.f32.mrb[7].mxu0  ;;  %v979_v31 = vsel %vm401_vm2, %v975_v29, -inf }
 0x2ab   : > { %980 = vmax.xlane.f32.xlu0 %v979_v31 }
 0x2be   : > { %v480_v32 = vpop.xlane.xlu0 %479 }
 0x2bf   : > { %v481_v33 = vsub.f32 %v474_v20, %v480_v32 }
 0x2c1   : > { %v482_v34 = vmul.f32 1.442695, %v481_v33 }
 0x2c3   : > { %1419 = vpow2.f32 %v482_v34 }
 0x2cd   : > { %v1420_v35 = vpop.eup %1419 }
 0x2ce   : > { %1292 = vmatmul.mubr.msk.f32.vlgmr.msra.gmra.mrb[2].mxu1 %vm401_vm2, %v1420_v35  ;;  %v484_v50 = vsel %vm401_vm2, %v1420_v35, 0.0 }
 0x2cf   : > { %1300 = vmatpush3.msra.mxu1 %v566_v10  ;;  %1301 = vmatprep.mubr.msk.f32.mxu1 %vm1621_vm0, %v1622_v1 }
 0x2d0   : > { %1309 = vmatprep.subr.mxu1 %v1622_v1 }
 0x330   : > { %v643_v36 = vpop.xlane.xlu1 %642 }
 0x331   : > { %v644_v37 = vsub.f32 %v637_v23, %v643_v36 }
 0x333   : > { %v645_v38 = vmul.f32 1.442695, %v644_v37 }
 0x334   : > { %v812_v39 = vpop.xlane.xlu0 %811 }
 0x335   : > { %1421 = vpow2.f32 %v645_v38  ;;  %v813_v40 = vsub.f32 %v806_v26, %v812_v39 }
 0x337   : > { %v814_v41 = vmul.f32 1.442695, %v813_v40 }
 0x338   : > { %v981_v42 = vpop.xlane.xlu0 %980 }
 0x339   : > { %1423 = vpow2.f32 %v814_v41  ;;  %v982_v43 = vsub.f32 %v975_v29, %v981_v42 }
 0x33b   : > { %v983_v44 = vmul.f32 1.442695, %v982_v43 }
 0x33d   : > { %1425 = vpow2.f32 %v983_v44 }
 0x33f   : > { %v1422_v45 = vpop.eup %1421 }
 0x340   : > { %1302 = vmatmul.mubr.msk.f32.vlgmr.msra.gmra.mrb[4].mxu1 %vm401_vm2, %v1422_v45  ;;  %v647_v46 = vsel %vm401_vm2, %v1422_v45, 0.0 }
 0x341   : > { %1310 = vmatpush3.msra.mxu1 %v735_v15  ;;  %648 = vadd.xlane.f32.xlu1 %v647_v46 }
 0x342   : > { %1311 = vmatprep.mubr.msk.f32.mxu1 %vm1621_vm0, %v1622_v1  ;;  %1319 = vmatprep.subr.mxu1 %v1622_v1 }
 0x343   : > { %v1424_v47 = vpop.eup %1423 }
 0x344   : > { %1312 = vmatmul.mubr.msk.f32.vlgmr.msra.gmra.mrb[6].mxu1 %vm401_vm2, %v1424_v47  ;;  %v816_v48 = vsel %vm401_vm2, %v1424_v47, 0.0 }
 0x345   : > { %1320 = vmatpush3.msra.mxu1 %v904_v18  ;;  %817 = vadd.xlane.f32.xlu0 %v816_v48 }
 0x346   : > { %1321 = vmatprep.mubr.msk.f32.mxu1 %vm1621_vm0, %v1622_v1 }
 0x347   : > { %v1426_v49 = vpop.eup %1425 }
 0x348   : > { %1322 = vmatmul.mubr.msk.f32.vlgmr.msra.gmra.mrb[8].mxu1 %vm401_vm2, %v1426_v49  ;;  %v985_v51 = vsel %vm401_vm2, %v1426_v49, 0.0 }
 0x349   : > { %485 = vadd.xlane.f32.xlu0 %v484_v50  ;;  %986 = vadd.xlane.f32.xlu1 %v985_v51 }
 0x3a1   : > { %v557_v52 = vpop.f32.mrb[2].mxu1 }
 0x3a2   : > { %v1293_v53 = vpop.f32.mrb[3].mxu1 }
 0x3ce   : > { %v649_v58 = vpop.xlane.xlu1 %648 }
 0x3d2   : > { %v818_v54 = vpop.xlane.xlu0 %817 }
 0x3d6   : > { %v486_v55 = vpop.xlane.xlu0 %485  ;;  %v987_v59 = vpop.xlane.xlu1 %986 }
 0x3d7   : > { %1427 = vrcp.f32 %v486_v55 }
 0x3d8   : > { %1429 = vrcp.f32 %v649_v58 }
 0x3d9   : > { %1431 = vrcp.f32 %v818_v54 }
 0x3da   : > { %1433 = vrcp.f32 %v987_v59 }
 0x3e1   : > { %v1428_v56 = vpop.eup %1427 }
 0x3e2   : > { %v561_v57 = vmul.f32 %v1428_v56, %v557_v52  ;;  %v1430_v60 = vpop.eup %1429 }
 0x3e3   : > { %v1432_v0 = vpop.eup %1431 }
 0x3e4   : > { %562 = vst.msk [vmem:[#allocation2] sm:$0xff] %vm401_vm2, %v561_v57  ;;  %v1434_v4 = vpop.eup %1433 }
 0x413   : > { %v721_v61 = vpop.f32.mrb[4].mxu1 }
 0x414   : > { %v725_v62 = vmul.f32 %v1430_v60, %v721_v61  ;;  %v1303_v63 = vpop.f32.mrb[5].mxu1 }
 0x416   : > { %727 = vrot.lane.b32.xlu1 %v725_v62, %s1626_s8 }
 0x417   : > { %v890_v1 = vpop.f32.mrb[6].mxu1 }
 0x418   : > { %v894_v2 = vmul.f32 %v1432_v0, %v890_v1  ;;  %v1313_v3 = vpop.f32.mrb[7].mxu1 }
 0x41a   : > { %896 = vrot.lane.b32.xlu0 %v894_v2, %s1627_s26 }
 0x41b   : > { %v1059_v5 = vpop.f32.mrb[8].mxu1 }
 0x41c   : > { %v1063_v6 = vmul.f32 %v1434_v4, %v1059_v5  ;;  %v1323_v7 = vpop.f32.mrb[9].mxu1 }
 0x41e   : > { %1065 = vrot.lane.b32.xlu1 %v1063_v6, %s1628_s19 }
 0x488   : > { %v728_v8 = vpop.permute.xlu1 %727 }
 0x489   : > { %731 = vst.msk [vmem:[#allocation2] sm:$0xff] %vm730_vm3, %v728_v8 }
 0x48c   : > { %v897_v9 = vpop.permute.xlu0 %896 }
 0x48d   : > { %900 = vst.msk [vmem:[#allocation2] sm:$0xff] %vm899_vm4, %v897_v9 }
 0x490   : > { %v1066_v10 = vpop.permute.xlu1 %1065 }
 0x491   : > { %1069 = vst.msk [vmem:[#allocation2] sm:$0xff] %vm1068_vm5, %v1066_v10 }
 0x498   : > { %v1070_v11 = vld [vmem:[#allocation2] sm:$0xff] }
 0x499   : > { %1071 = vst.msk [vmem:[%s310_s11] sm:$0xff] %vm326_vm1, %v1070_v11 }
 0x49a   : > { %1536 = shalt.err (!%p1533_p4)
}
 0x49b   : > { %s1537_s10 = scalar_lea.hbm %s1910_s22, 128  ;;  %s1541_s29 = scalar_lea.hbm %s1964_s4, 256 }
 0x49c   : > { %p1538_p8 = scmp.ne.s32.totalorder %s1910_s22, %s1537_s10  ;;  %p1542_p10 = scmp.lt.u32.totalorder %s1910_s22, %s1964_s4 }
 0x49d   : > { %p1543_p13 = scmp.lt.u32.totalorder %s1541_s29, %s1537_s10  ;;  %p1545_p12 = scmp.lt.u32.totalorder %s1537_s10, %s1910_s22 }
 0x49e   : > { %p1539_p11 = pnand %p1538_p8, %p1987_p0 }
 0x49f   : > { %p1544_p3 = por %p1543_p13, %p1542_p10 }
 0x4a0   : > { %p1540_p6 = pneg %p1539_p11 }
 0x4a1   : > { %p1546_p5 = por %p1545_p12, %p1544_p3 }
 0x4a3   : > { %p1547_p9 = pnand %p1546_p5, %p1540_p6 }
 0x4a5   : > { %1550 = shalt.err (!%p1547_p9)
}
 0x4a6   : > { %1338 = dma.vmem_to_hbm [thread:$0]  (%p1987_p0), %s1912_s13, 128, %s1910_s22, %s1073_s25  }
 0x4a7 PF: > { %s1100_s8 = sand.u32 1, %s1593_s15   ;;  %p1988_p1 = scmp.ne.s32.totalorder %s1974_s24, 0 }
 0x4a8   : > { %p1989_p2 = scmp.ge.s32.totalorder %s1613_s20, 2  ;;  %s1101_s26 = scalar_lea.sflag [#allocation5], %s1100_s8 }
 0x4aa   : > { %p1352_p7 = pnand %p1989_p2, %p1988_p1 }
 0x4ac   : > { %1588 = dma.done.wait (!%p1352_p7), %s1101_s26, 128  }
 0x4ad   : > { %1590 = vsyncadd (!%p1352_p7), %s1101_s26, 4294967168  ;;  %s23_s20 = sadd.s32 1, %s1613_s20   ;;  %s1990_s18 = sld [smem:[#allocation14_spill]] }
 0x4ae   : > { %p20_p4 = scmp.ge.s32.totalorder %s23_s20, 4   ;;  %s1991_s19 = sld [smem:[#allocation15_spill]] }
 0x4af   : > { %s1992_s15 = smov %s1597_s16  ;;  %s1993_s16 = smov %s1601_s17 }
 0x4b0   : > { %s1994_s17 = smov %s1758_s7  ;;  %22 = sbr.rel (!%p20_p4) target bundleno = 10 (0xa), region = 102 }
 0x4b7   :  { %1106 = vsyncpa [#allocation4], 1 }
 0x4b8   :  { %1108 = vsyncpa [#allocation4 + $0x1], 1 }
 0x4b9   :  { %1109 = vsyncpa [#allocation7], 1 }
 0x4ba   :  { %1111 = vsyncpa [#allocation7 + $0x1], 1 }
 0x4bb   :  { %1112 = vsyncpa [#allocation5], 1 }
 0x4bc   :  { %1114 = vsyncpa [#allocation5 + $0x1], 1 }

</bundles_post_ra>
